<compile_context>
chip_gen: v7x
topology: tpu7x:2x2x1
jax: 0.10.0
libtpu: 0.0.40
codegen_flags: <defaults>
</compile_context>

<pallas_src>
import functools

import jax
import jax.numpy as jnp
from jax.experimental import pallas as pl
from jax.experimental.pallas import tpu as pltpu


def _yolo_decode_kernel(p_ref, grid_ref, anchor_ref, io_ref, *, stride):
    """Decode one (TB, C, L) block of raw YOLO predictions.

    Layout: C = nc+5 on the sublane axis, L = ng*ng on the lane axis.
      c in {0,1}: (sigmoid(p) + grid_offset) * stride
      c in {2,3}: (exp(p)     * anchor_wh  ) * stride
      c >= 4   :  sigmoid(p)
    grid_ref   : (1, 2, L)  x/y cell offsets (broadcast over TB)
    anchor_ref : (TB, 2, 1) anchor w/h in grid units (broadcast over L)
    """
    p = p_ref[...].astype(jnp.float32)                       # (TB, C, L)
    sig = jax.nn.sigmoid(p)

    # Dense full-block store covers the objectness/class channels (c >= 4);
    # the 4 box channels are overwritten below with small sliced stores.
    io_ref[...] = sig.astype(io_ref.dtype)

    # xy channels 0:2 : (sigmoid + grid offset) * stride
    xy = (sig[:, 0:2, :] + grid_ref[...]) * stride
    io_ref[:, 0:2, :] = xy.astype(io_ref.dtype)

    # wh channels 2:4 : exp over only 2 of C channels (sliced EUP work,
    # no full-width exp temp, no inf in discarded lanes).
    wh = jnp.exp(p[:, 2:4, :]) * anchor_ref[...] * stride
    io_ref[:, 2:4, :] = wh.astype(io_ref.dtype)


def _vmem_capacity_bytes():
    try:
        return int(pltpu.get_tpu_info().vmem_capacity_bytes)
    except Exception:
        return 64 << 20          # conservative fallback (v7x per-TC VMEM)


def _round_up(x, m):
    return (x + m - 1) // m * m


def _pick_block_batch(B, plane_bytes, target_bytes, min_steps=8):
    """Batch (b, a) planes per grid step so each step moves ~target_bytes,
    while keeping >= min(min_steps, B) grid steps so both TensorCores (v7x)
    get several steps each and the software pipeline has work to overlap."""
    tb = int(max(1, min(B, target_bytes // max(plane_bytes, 1))))
    while B % tb:
        tb -= 1
    want_steps = min(min_steps, B)
    while tb > 1 and B // tb < want_steps:
        tb = max(1, tb // 2)
        while B % tb:
            tb -= 1
    return tb


def yolo_layer_forward(p, anchors, img_size, nc, *, return_p=True,
                       out_dtype=jnp.float32):
    """Equivalent of YOLOLayer.forward(p, img_size) in eval mode.

    Returns (io, p_perm):
      io     : (bs, na*ng*ng, nc+5) decoded boxes/conf/cls (dtype = out_dtype;
               pass jnp.bfloat16 if downstream tolerates it -> ~25-33% less
               HBM store traffic; compute stays f32).
      p_perm : (bs, na, ng, ng, nc+5) permuted raw predictions, or None when
               return_p=False (it is only consumed by the training loss and
               costs a full extra transpose pass).
    """
    bs, ch, ng, ng2 = p.shape
    assert ng == ng2
    na = anchors.shape[0]
    C = nc + 5
    assert ch == na * C
    stride = float(img_size) / float(ng)
    L = ng * ng
    B = bs * na

    # (bs, na*(nc+5), ng, ng) -> (bs*na, nc+5, ng*ng).
    # NOTE: merging the minor (ng, ng) dims changes the (8,128) physical tiling,
    # so XLA may materialize a relayout copy here; if it shows in the profile,
    # fold the (B, C, L) layout into the producing conv's output instead.
    p_bcl = p.reshape(B, C, L)

    # Grid cell offsets, (1, 2, L): channel 0 = x offset (w index),
    # channel 1 = y offset (h index).
    ar = jnp.arange(ng, dtype=jnp.float32)
    gx = jnp.broadcast_to(ar[None, :], (ng, ng)).reshape(L)
    gy = jnp.broadcast_to(ar[:, None], (ng, ng)).reshape(L)
    grid_add = jnp.stack([gx, gy], axis=0)[None]               # (1, 2, L)

    # Anchor w/h in grid units, (B, 2, 1); anchor index a = b % na.
    anchor_vec = anchors.astype(jnp.float32) / stride          # (na, 2)
    anchor_mul = jnp.tile(anchor_vec, (bs, 1)).reshape(B, 2, 1)

    # --- tiling / VMEM budget (generation aware) ---------------------------
    vmem_cap = _vmem_capacity_bytes()
    # 128 MiB-VMEM parts (v5e/v6e): aim for ~4 MiB blocks (85%+ of HBM
    # roofline regime); 64 MiB parts (v7x): cap at ~2 MiB.
    target_bytes = (4 << 20) if vmem_cap >= (100 << 20) else (2 << 20)
    in_itemsize = jnp.dtype(p.dtype).itemsize
    out_itemsize = jnp.dtype(out_dtype).itemsize
    plane_bytes = C * L * max(in_itemsize, out_itemsize)
    TB = _pick_block_batch(B, plane_bytes, target_bytes, min_steps=8)
    grid = (B // TB,)

    # Explicit scoped-VMEM limit sized from the actual (padded) block residency
    # (double-buffered in + out + aux planes) so we do not depend on the
    # per-generation default scoped limit (16 MiB v5e / 32 MiB v6e / 32 MiB v7x).
    c_pad, l_pad = _round_up(C, 8), _round_up(L, 128)
    per_step = (TB * c_pad * l_pad * (in_itemsize + out_itemsize)
                + 8 * l_pad * 4            # grid plane (padded)
                + TB * 8 * 128 * 4)        # anchor plane (padded)
    vmem_limit = int(min(max(per_step * 2 * 5 // 4 + (2 << 20), 32 << 20),
                         vmem_cap * 3 // 4))

    io_bcl = pl.pallas_call(
        functools.partial(_yolo_decode_kernel, stride=stride),
        out_shape=jax.ShapeDtypeStruct((B, C, L), out_dtype),
        grid=grid,
        in_specs=[
            pl.BlockSpec((TB, C, L), lambda i: (i, 0, 0)),
            pl.BlockSpec((1, 2, L), lambda i: (0, 0, 0)),
            pl.BlockSpec((TB, 2, 1), lambda i: (i, 0, 0)),
        ],
        out_specs=pl.BlockSpec((TB, C, L), lambda i: (i, 0, 0)),
        compiler_params=pltpu.CompilerParams(
            dimension_semantics=("parallel",),
            vmem_limit_bytes=vmem_limit),
    )(p_bcl, grid_add, anchor_mul)

    # Wrapper-side layout plumbing (XLA): lane-dense kernel output -> PyTorch
    # (bs, na*ng*ng, nc+5) layout.  This transpose is a full HBM round trip; if
    # the downstream consumer (score filter / NMS) can take channel-major
    # (B, C, L) directly, skip it.
    io = io_bcl.reshape(bs, na, C, ng, ng).transpose(0, 1, 3, 4, 2).reshape(bs, -1, C)
    if not return_p:
        return io, None
    p_perm = p_bcl.reshape(bs, na, C, ng, ng).transpose(0, 1, 3, 4, 2)
    return io, p_perm
    # TODO(synk): ONNX_EXPORT branch and the host-side create_grids caching are
    # trace-time/host logic with no Pallas equivalent; only the eval-mode decode
    # (which also yields the training-mode tensor p_perm) is implemented.


def _reference_yolo(p, anchors, img_size, nc):
    """Pure-JAX replica of the PyTorch eval-mode forward."""
    bs, _, ng, _ = p.shape
    na = anchors.shape[0]
    C = nc + 5
    stride = float(img_size) / float(ng)
    p5 = p.reshape(bs, na, C, ng, ng).transpose(0, 1, 3, 4, 2)      # (bs,na,ng,ng,C)
    grid_x = jnp.broadcast_to(jnp.arange(ng, dtype=jnp.float32)[None, :], (ng, ng))
    grid_y = grid_x.T
    grid_xy = jnp.stack([grid_x, grid_y], -1).reshape(1, 1, ng, ng, 2)
    anchor_wh = (anchors.astype(jnp.float32) / stride).reshape(1, na, 1, 1, 2)
    xy = (jax.nn.sigmoid(p5[..., 0:2]) + grid_xy) * stride
    wh = jnp.exp(p5[..., 2:4]) * anchor_wh * stride
    rest = jax.nn.sigmoid(p5[..., 4:])
    io = jnp.concatenate([xy, wh, rest], axis=-1)
    return io.reshape(bs, -1, C), p5


if __name__ == "__main__":
    key = jax.random.PRNGKey(0)
    bs, na, nc, ng = 2, 3, 7, 16          # nc+5 = 12 channels per anchor
    img_size = 512                        # stride = 512 / 16 = 32
    anchors = jnp.array([[10.0, 13.0], [16.0, 30.0], [33.0, 23.0]], jnp.float32)

    p = jax.random.normal(key, (bs, na * (nc + 5), ng, ng), dtype=jnp.float32)

    io, p_perm = yolo_layer_forward(p, anchors, img_size, nc)
    io = jax.block_until_ready(io)
    p_perm = jax.block_until_ready(p_perm)

    io_ref, p_ref = _reference_yolo(p, anchors, img_size, nc)

    assert io.shape == (bs, na * ng * ng, nc + 5), io.shape
    assert p_perm.shape == (bs, na, ng, ng, nc + 5), p_perm.shape
    assert jnp.allclose(io, io_ref, atol=1e-5, rtol=1e-5), "io mismatch vs reference"
    assert jnp.allclose(p_perm, p_ref), "p mismatch vs reference"

    print("KERNEL_OK")
</pallas_src>

<mosaic_0001>
module attributes {stable_mosaic.version = 11 : i64} {
  func.func @_yolo_decode_kernel(%arg0: i32, %arg1: memref<1x12x256xf32, #tpu.memory_space<vmem>>, %arg2: memref<1x2x256xf32, #tpu.memory_space<vmem>>, %arg3: memref<1x2x1xf32, #tpu.memory_space<vmem>>, %arg4: memref<1x12x256xf32, #tpu.memory_space<vmem>>) attributes {dimension_semantics = [#tpu.dimension_semantics<parallel>], iteration_bounds = array<i64: 6>, scalar_prefetch = 0 : i64, scratch_operands = 0 : i64, tpu.core_type = #tpu.core_type<tc>, window_params = [{transform_indices = @transform_0, window_bounds = array<i64: 1, 12, 256>}, {pipeline_mode = #tpu.pipeline_mode<synchronous>, transform_indices = @transform_1, window_bounds = array<i64: 1, 2, 256>}, {transform_indices = @transform_2, window_bounds = array<i64: 1, 2, 1>}, {transform_indices = @transform_3, window_bounds = array<i64: 1, 12, 256>}]} {
    %c0 = arith.constant 0 : index
    %c0_0 = arith.constant 0 : index
    %c0_1 = arith.constant 0 : index
    %0 = vector.load %arg1[%c0, %c0_0, %c0_1] : memref<1x12x256xf32, #tpu.memory_space<vmem>>, vector<1x12x256xf32>
    %1 = arith.negf %0 : vector<1x12x256xf32>
    %2 = math.exp %1 : vector<1x12x256xf32>
    %cst = arith.constant 1.000000e+00 : f32
    %3 = vector.broadcast %cst : f32 to vector<1x12x256xf32>
    %4 = arith.addf %3, %2 : vector<1x12x256xf32>
    %5 = arith.divf %3, %4 : vector<1x12x256xf32>
    %c0_2 = arith.constant 0 : index
    %c0_3 = arith.constant 0 : index
    %c0_4 = arith.constant 0 : index
    %6 = vector.load %arg4[%c0_2, %c0_3, %c0_4] : memref<1x12x256xf32, #tpu.memory_space<vmem>>, vector<1x12x256xf32>
    tpu.vector_store %arg4[%c0_2, %c0_3, %c0_4], %5 {strides = array<i32>} : memref<1x12x256xf32, #tpu.memory_space<vmem>>, vector<1x12x256xf32>,
    %7 = vector.extract_strided_slice %5 {offsets = [0, 0, 0], sizes = [1, 2, 256], strides = [1, 1, 1]} : vector<1x12x256xf32> to vector<1x2x256xf32>
    %c0_5 = arith.constant 0 : index
    %c0_6 = arith.constant 0 : index
    %c0_7 = arith.constant 0 : index
    %8 = vector.load %arg2[%c0_5, %c0_6, %c0_7] : memref<1x2x256xf32, #tpu.memory_space<vmem>>, vector<1x2x256xf32>
    %9 = arith.addf %7, %8 : vector<1x2x256xf32>
    %cst_8 = arith.constant 3.200000e+01 : f32
    %10 = vector.broadcast %cst_8 : f32 to vector<1x2x256xf32>
    %11 = arith.mulf %9, %10 : vector<1x2x256xf32>
    %c0_9 = arith.constant 0 : index
    %c0_10 = arith.constant 0 : index
    %c0_11 = arith.constant 0 : index
    %12 = vector.load %arg4[%c0_9, %c0_10, %c0_11] : memref<1x12x256xf32, #tpu.memory_space<vmem>>, vector<1x2x256xf32>
    tpu.vector_store %arg4[%c0_9, %c0_10, %c0_11], %11 {strides = array<i32>} : memref<1x12x256xf32, #tpu.memory_space<vmem>>, vector<1x2x256xf32>,
    %13 = vector.extract_strided_slice %0 {offsets = [0, 2, 0], sizes = [1, 2, 256], strides = [1, 1, 1]} : vector<1x12x256xf32> to vector<1x2x256xf32>
    %14 = math.exp %13 : vector<1x2x256xf32>
    %c0_12 = arith.constant 0 : index
    %c0_13 = arith.constant 0 : index
    %c0_14 = arith.constant 0 : index
    %15 = vector.load %arg3[%c0_12, %c0_13, %c0_14] : memref<1x2x1xf32, #tpu.memory_space<vmem>>, vector<1x2x1xf32>
    %16 = vector.broadcast %15 : vector<1x2x1xf32> to vector<1x2x256xf32>
    %17 = arith.mulf %14, %16 : vector<1x2x256xf32>
    %cst_15 = arith.constant 3.200000e+01 : f32
    %18 = vector.broadcast %cst_15 : f32 to vector<1x2x256xf32>
    %19 = arith.mulf %17, %18 : vector<1x2x256xf32>
    %c0_16 = arith.constant 0 : index
    %c2 = arith.constant 2 : index
    %c0_17 = arith.constant 0 : index
    %20 = vector.load %arg4[%c0_16, %c2, %c0_17] : memref<1x12x256xf32, #tpu.memory_space<vmem>>, vector<1x2x256xf32>
    tpu.vector_store %arg4[%c0_16, %c2, %c0_17], %19 {strides = array<i32>} : memref<1x12x256xf32, #tpu.memory_space<vmem>>, vector<1x2x256xf32>,
    return
  }
  func.func @transform_0(%arg0: i32) -> (i32, i32, i32) {
    %c0_i32 = arith.constant 0 : i32
    %c0_i32_0 = arith.constant 0 : i32
    %c0_i32_1 = arith.constant 0 : i32
    return %arg0, %c0_i32, %c0_i32_0 : i32, i32, i32
  }
  func.func @transform_1(%arg0: i32) -> (i32, i32, i32) {
    %c0_i32 = arith.constant 0 : i32
    %c0_i32_0 = arith.constant 0 : i32
    %c0_i32_1 = arith.constant 0 : i32
    %c0_i32_2 = arith.constant 0 : i32
    return %c0_i32, %c0_i32_0, %c0_i32_1 : i32, i32, i32
  }
  func.func @transform_2(%arg0: i32) -> (i32, i32, i32) {
    %c0_i32 = arith.constant 0 : i32
    %c0_i32_0 = arith.constant 0 : i32
    %c0_i32_1 = arith.constant 0 : i32
    return %arg0, %c0_i32, %c0_i32_0 : i32, i32, i32
  }
  func.func @transform_3(%arg0: i32) -> (i32, i32, i32) {
    %c0_i32 = arith.constant 0 : i32
    %c0_i32_0 = arith.constant 0 : i32
    %c0_i32_1 = arith.constant 0 : i32
    return %arg0, %c0_i32, %c0_i32_0 : i32, i32, i32
  }
}

</mosaic_0001>

<bundles_post_ra>
// kernel: tpu_custom_call.1
= control target key start
LH: loop header
LB: loop body
LE: loop exit
PB: predicated region body
PF: predicated region fallthrough
CT: control target
= control target key end

     0   :  { %8 = vsyncpa [#allocation3], 0  ;;  %s763_s0 = inlined_call_operand.hbm [shape: f32[6,12,256], index: 0, kind: input, shape index: {}]   ;;  %s764_s1 = inlined_call_operand.vmem [shape: f32[1,2,256], index: 1, kind: input, shape index: {}]   ;;  %s765_s2 = inlined_call_operand.vmem [shape: f32[6,2,1], index: 2, kind: input, shape index: {}]   ;;  %s766_s3 = inlined_call_operand.hbm [shape: f32[6,12,256], index: 3, kind: output, shape index: {}]  }
   0x1   :  { %10 = vsyncpa [#allocation3 + $0x1], 0 }
   0x2   :  { %11 = vsyncpa [#allocation4], 0 }
   0x3   :  { %13 = vsyncpa [#allocation4 + $0x1], 0  ;;  %s591_s12 = smov 0   ;;  %s593_s13 = smov 0  }
   0x4   :  { %s595_s14 = smov 0   ;;  %s597_s15 = smov 0  }
   0x5 LB: > { %s612_s16 = sadd.s32 4294967295, %s562_s15   ;;  %s372_s17 = sadd.s32 4294967294, %s562_s15   ;;  %s562_s15 = sphi %s597_s15, %s778_s15   ;;  %s558_s14 = sphi %s595_s14, %s777_s14   ;;  %s554_s13 = sphi %s593_s13, %s776_s13   ;;  %s550_s12 = sphi %s591_s12, %s775_s12  }
   0x6   : > { %s616_s18 = sadd.s32 1, %s562_s15   ;;  %s26_s19 = sadd.s32 1, %s558_s14 }
   0x7   : > { %s23_s20 = ssub.s32 %s562_s15, %s616_s18  ;;  %p33_p0 = scmp.ne.s32.totalorder %s558_s14, %s554_s13 }
   0x8   : > { %p24_p1 = scmp.eq.s32.totalorder %s23_s20, 0  ;;  %p34_p2 = scmp.eq.s32.totalorder %s562_s15, 0 }
   0x9   : > { %p39_p3 = scmp.ne.s32.totalorder %s554_s13, %s550_s12  ;;  %p40_p4 = scmp.eq.s32.totalorder %s612_s16, 0 }
   0xa   : > { %s628_s21 = scalar_select %p24_p1, %s558_s14, %s26_s19  }
   0xb   : > { %p630_p5 = por %p34_p2, %p33_p0  ;;  %p634_p6 = por %p40_p4, %p39_p3 }
   0xc   : > { %p110_p7 = scmp.eq.s32.totalorder %s612_s16, 5  ;;  %p116_p8 = scmp.eq.s32.totalorder %s372_s17, 5 }
   0xd   : > { %p406_p9 = scmp.lt.s32.totalorder %s562_s15, 6  ;;  %s139_s26 = sand.u32 1, %s558_s14  }
   0xe   : > { %p640_p10 = por %p110_p7, %p33_p0  ;;  %p644_p11 = por %p116_p8, %p39_p3 }
   0xf   : > { %s392_s27 = sshll.u32 %s562_s15, 9  ;;  %s375_s28 = sshll.u32 %s139_s26, 5 }
  0x10   : > { %s770_s24 = scalar_select %p640_p10, 1, 0 }
  0x11   : > { %s771_s25 = scalar_select %p644_p11, 1, 0 }
  0x12   : > { %s653_s4 = scalar_lea.hbm %s763_s0, %s392_s27  ;;  %s143_s5 = scalar_lea.vmem [#allocation2], %s375_s28 }
  0x13   : > { %s150_s6 = sshll.u32 %s143_s5, 4  ;;  %p657_p12 = pnand %p406_p9, %p630_p5  ;;  %s661_s6 = int_to_ptr.vmem [resolvable:$true] %s150_s6 }
  0x14   : > { %s663_s8 = scalar_lea.sflag [#allocation3], %s139_s26  ;;  %s466_s9 = scalar_lea.hbm %s653_s4, 512 }
  0x15   : > { %p467_p13 = scmp.ne.s32.totalorder %s653_s4, %s466_s9  ;;  %p468_p0 = pneg %p657_p12 }
  0x16   : > { %s471_s17 = scalar_lea.hbm %s763_s0, 3072  ;;  %p472_p3 = scmp.lt.u32.totalorder %s653_s4, %s763_s0 }
  0x17   : > { %p469_p1 = pnand %p468_p0, %p467_p13  ;;  %p473_p4 = scmp.lt.u32.totalorder %s471_s17, %s466_s9 }
  0x18   : > { %p475_p7 = scmp.lt.u32.totalorder %s466_s9, %s653_s4 }
  0x19   : > { %p470_p2 = pneg %p469_p1  ;;  %p474_p5 = por %p473_p4, %p472_p3 }
  0x1b   : > { %p476_p8 = por %p475_p7, %p474_p5 }
  0x1d   : > { %p477_p9 = pnand %p476_p8, %p470_p2 }
  0x1f   : > { %480 = shalt.err (!%p477_p9)
}
  0x20   : > { %s481_s22 = scalar_lea.vmem %s661_s6, 512  ;;  %s564_s26 = smov [#allocation2]  }
  0x21   : > { %p482_p13 = scmp.ne.s32.totalorder %s661_s6, %s481_s22  ;;  %s486_s27 = sshll.u32 %s564_s26, 4  ;;  %s487_s27 = int_to_ptr.vmem [resolvable:$false] %s486_s27 }
  0x22   : > { %s488_s28 = scalar_lea.vmem %s487_s27, 1024  ;;  %p489_p10 = scmp.lt.s32.totalorder %s661_s6, %s487_s27 }
  0x23   : > { %p484_p1 = pnand %p482_p13, %p468_p0  ;;  %p490_p3 = scmp.lt.s32.totalorder %s488_s28, %s481_s22 }
  0x25   : > { %p485_p11 = pneg %p484_p1  ;;  %p491_p4 = por %p490_p3, %p489_p10 }
  0x27   : > { %p492_p5 = pnand %p491_p4, %p485_p11 }
  0x29   : > { %495 = shalt.err (!%p492_p5)
}
  0x2a   : > { %s565_s29 = smov 256   ;;  %s566_s30 = smov 16  }
  0x2b   : > { %401 = dma.hbm_to_vmem [thread:$0]  (!%p657_p12), %s653_s4, 512, %s661_s6, %s663_s8, %s565_s29, %s565_s29, %s566_s30  }
  0x2c   : > { %p378_p0 = scmp.ge.s32.totalorder %s562_s15, 1  ;;  %p165_p2 = scmp.lt.s32.totalorder %s562_s15, 7 }
  0x2e   : > { %p166_p7 = pnand %p378_p0, %p165_p2 }
  0x2f   : > { %s694_s5 = sand.u32 (!%p166_p7), 1, %s554_s13  }
  0x30   : > { %169 = sbr.rel (%p166_p7) target bundleno = 212 (0xd4), region = 32  ;;  %s379_s9 = sshll.u32 (!%p166_p7), %s694_s5, 5 }
  0x31   : > { %s172_s10 = scalar_lea.sflag (!%p166_p7), [#allocation3], %s694_s5  ;;  %s175_s11 = scalar_lea.vmem (!%p166_p7), [#allocation2], %s379_s9 }
  0x37   : > { %541 = dma.done.wait (%p634_p6), %s172_s10, 512  }
  0x38   : > { %543 = vsyncadd (%p634_p6), %s172_s10, 4294966784  ;;  %p202_p10 = scmp.lt.s32.totalorder %s612_s16, 5  ;;  %v567_v0 = vmov 0   ;;  %v206_v2 = vld [vmem:[%s175_s11] sm:$0xff]  ;;  %v207_v3 = vld [vmem:[%s175_s11 + $0x8] sm:$0xff]  ;;  %s201_s20 = scalar_lea.vmem [#allocation5], %s379_s9 }
  0x39   : > { %445 = vset.pattern.permute.xlu0 %v567_v0  ;;  %v382_v4 = vmul.f32 -1.442695, %v206_v2  ;;  %v383_v5 = vmul.f32 -1.442695, %v207_v3  ;;  %v208_v6 = vld [vmem:[%s175_s11 + $0x10] sm:$0xf] }
  0x3a   : > { %s203_s4 = scalar_select %p202_p10, %s612_s16, 5  ;;  %v209_v7 = vld [vmem:[%s175_s11 + $0x18] sm:$0xf]  ;;  %v384_v8 = vmul.f32 -1.442695, %v208_v6 }
  0x3b   : > { %446 = vpow2.f32 %v382_v4  ;;  %v385_v9 = vmul.f32 -1.442695, %v209_v7  ;;  %v386_v18 = vld.sshfl [vmem:[%s764_s1] sm:$0x33 pattern:$0x76325410] }
  0x3c   : > { %s381_s6 = sshll.u32 %s203_s4, 1  ;;  %448 = vpow2.f32 %v383_v5  ;;  %v247_v19 = vcombine.high %v386_v18, %v386_v18  ;;  %v256_v28 = vmul.f32 1.442695, %v206_v2  ;;  %v258_v29 = vmul.f32 1.442695, %v207_v3  ;;  %s393_s22 = sshll.u32 %s612_s16, 9 }
  0x3d   : > { %s205_s17 = scalar_lea.vmem %s765_s2, %s381_s6  ;;  %450 = vpow2.f32 %v384_v8  ;;  %s287_s26 = sshll.u32 %s201_s20, 4  ;;  %s720_s26 = int_to_ptr.vmem [resolvable:$true] %s287_s26 }
  0x3e   : > { %v260_v1 = vld [vmem:[%s205_s17] sm:$0x3]  ;;  %452 = vpow2.f32 %v385_v9  ;;  %s718_s29 = scalar_lea.hbm %s766_s3, %s393_s22  ;;  %s274_s30 = scalar_lea.sflag [#allocation4], %s694_s5 }
  0x3f   : > { %263 = vperm.xlu0 %445, %v260_v1   ;;  %s496_s9 = scalar_lea.vmem %s720_s26, 512  ;;  %p773_p11 = scmp.ne.s32.totalorder %s770_s24, 0 }
  0x40   : > { %p497_p6 = scmp.ne.s32.totalorder %s720_s26, %s496_s9  ;;  %s568_s16 = smov [#allocation5]  }
  0x41   : > { %s500_s10 = sshll.u32 %s568_s16, 4  ;;  %s501_s10 = int_to_ptr.vmem [resolvable:$false] %s500_s10 }
  0x42   : > { %p498_p12 = pnand %p497_p6, %p773_p11  ;;  %s502_s11 = scalar_lea.vmem %s501_s10, 1024 }
  0x43   : > { %p503_p9 = scmp.lt.s32.totalorder %s720_s26, %s501_s10  ;;  %p504_p13 = scmp.lt.s32.totalorder %s502_s11, %s496_s9 }
  0x44   : > { %p499_p8 = pneg %p498_p12 }
  0x45   : > { %v447_v10 = vpop.eup %446  ;;  %p505_p1 = por %p504_p13, %p503_p9 }
  0x46   : > { %v449_v11 = vpop.eup %448  ;;  %v222_v12 = vadd.f32 1.0, %v447_v10 }
  0x47   : > { %v223_v13 = vadd.f32 1.0, %v449_v11  ;;  %v451_v14 = vpop.eup %450  ;;  %p506_p3 = pnand %p505_p1, %p499_p8 }
  0x48   : > { %454 = vrcp.f32 %v222_v12  ;;  %v453_v15 = vpop.eup %452  ;;  %v224_v16 = vadd.f32 1.0, %v451_v14 }
  0x49   : > { %456 = vrcp.f32 %v223_v13  ;;  %v225_v17 = vadd.f32 1.0, %v453_v15 }
  0x4a   : > { %458 = vrcp.f32 %v224_v16 }
  0x4b   : > { %460 = vrcp.f32 %v225_v17 }
  0x4c   : > { %462 = vpow2.f32 %v256_v28 }
  0x4d   : > { %464 = vpow2.f32 %v258_v29 }
  0x52   : > { %v455_v20 = vpop.eup %454 }
  0x53   : > { %v457_v21 = vpop.eup %456  ;;  %234 = vst [vmem:[%s201_s20] sm:$0xff] %v455_v20  ;;  %v250_v22 = vadd.f32 %v455_v20, %v386_v18 }
  0x54   : > { %235 = vst [vmem:[%s201_s20 + $0x8] sm:$0xff] %v457_v21  ;;  %v251_v23 = vadd.f32 %v457_v21, %v247_v19  ;;  %v459_v25 = vpop.eup %458 }
  0x55   : > { %v252_v24 = vmul.f32 32.0, %v250_v22  ;;  %v461_v27 = vpop.eup %460  ;;  %236 = vst [vmem:[%s201_s20 + $0x10] sm:$0xf] %v459_v25 }
  0x56   : > { %v253_v26 = vmul.f32 32.0, %v251_v23  ;;  %237 = vst [vmem:[%s201_s20 + $0x18] sm:$0xf] %v461_v27  ;;  %v463_v30 = vpop.eup %462 }
  0x57   : > { %254 = vst [vmem:[%s201_s20] sm:$0x3] %v252_v24  ;;  %v465_v31 = vpop.eup %464 }
  0x58   : > { %255 = vst [vmem:[%s201_s20 + $0x8] sm:$0x3] %v253_v26 }
  0xbe   : > { %v264_v32 = vpop.permute.xlu0 %263 }
  0xbf   : > { %v265_v33 = vrot.slane %v264_v32, 6 }
  0xc1   : > { %v267_v34 = vmul.f32 %v463_v30, %v265_v33  ;;  %v268_v35 = vmul.f32 %v465_v31, %v265_v33 }
  0xc3   : > { %v269_v36 = vmul.f32 32.0, %v267_v34  ;;  %v270_v37 = vmul.f32 32.0, %v268_v35 }
  0xc5   : > { %271 = vst [vmem:[%s201_s20] sm:$0xc] %v269_v36  ;;  %272 = vst [vmem:[%s201_s20 + $0x8] sm:$0xc] %v270_v37 }
  0xc6   : > { %509 = shalt.err (!%p506_p3)
}
  0xc7   : > { %s510_s4 = scalar_lea.hbm %s718_s29, 512  ;;  %s514_s8 = scalar_lea.hbm %s766_s3, 3072 }
  0xc8   : > { %p511_p4 = scmp.ne.s32.totalorder %s718_s29, %s510_s4  ;;  %p515_p2 = scmp.lt.u32.totalorder %s718_s29, %s766_s3 }
  0xc9   : > { %p516_p7 = scmp.lt.u32.totalorder %s514_s8, %s510_s4  ;;  %p518_p6 = scmp.lt.u32.totalorder %s510_s4, %s718_s29 }
  0xca   : > { %p512_p5 = pnand %p511_p4, %p773_p11 }
  0xcb   : > { %p517_p10 = por %p516_p7, %p515_p2 }
  0xcc   : > { %p513_p0 = pneg %p512_p5 }
  0xcd   : > { %p519_p12 = por %p518_p6, %p517_p10 }
  0xcf   : > { %p520_p8 = pnand %p519_p12, %p513_p0 }
  0xd1   : > { %523 = shalt.err (!%p520_p8)
}
  0xd2   : > { %s569_s19 = smov 256   ;;  %s570_s20 = smov 16  }
  0xd3   : > { %396 = dma.vmem_to_hbm [thread:$0]  (%p773_p11), %s720_s26, 512, %s718_s29, %s274_s30, %s569_s19, %s569_s19, %s570_s20  }
  0xd4 PF: > { %p407_p9 = scmp.ge.s32.totalorder %s562_s15, 2  ;;  %s302_s22 = sand.u32 1, %s550_s12  }
  0xd5   : > { %p774_p13 = scmp.ne.s32.totalorder %s771_s25, 0  ;;  %s303_s27 = scalar_lea.sflag [#allocation4], %s302_s22 }
  0xd7   : > { %p403_p1 = pnand %p407_p9, %p774_p13 }
  0xd9   : > { %545 = dma.done.wait (!%p403_p1), %s303_s27, 512  }
  0xda   : > { %547 = vsyncadd (!%p403_p1), %s303_s27, 4294966784  ;;  %p16_p3 = scmp.ge.s32.totalorder %s616_s18, 8   ;;  %s775_s12 = smov %s554_s13 }
  0xdb   : > { %s776_s13 = smov %s558_s14  ;;  %s777_s14 = smov %s628_s21 }
  0xdc   : > { %s778_s15 = smov %s616_s18  ;;  %18 = sbr.rel (!%p16_p3) target bundleno = 5 (0x5), region = 80 }
  0xe3   :  { %308 = vsyncpa [#allocation3], 1 }
  0xe4   :  { %310 = vsyncpa [#allocation3 + $0x1], 1 }
  0xe5   :  { %311 = vsyncpa [#allocation4], 1 }
  0xe6   :  { %313 = vsyncpa [#allocation4 + $0x1], 1 }

</bundles_post_ra>
